<compile_context>
chip_gen: v6e
topology: v6e:2x2x1
jax: 0.10.0
libtpu: 0.0.40
codegen_flags: <defaults>
</compile_context>

<pallas_src>
import functools

import jax
import jax.numpy as jnp
from jax.experimental import pallas as pl
from jax.experimental.pallas import tpu as pltpu


def _round_up(x, m):
    return ((x + m - 1) // m) * m


def _make_nce_hinge_kernel(margin):
    margin = float(margin)

    def kernel(s_ref, out_ref):
        # Zero the resident (1, 1) accumulator on the first grid step.
        @pl.when(pl.program_id(0) == 0)
        def _init():
            out_ref[...] = jnp.zeros_like(out_ref)

        s = s_ref[...]                                    # (tile_n, K) f32
        pos = s[:, 0:1]                                   # (tile_n, 1)

        # Column index along the lane axis.
        col = jax.lax.broadcasted_iota(jnp.int32, s.shape, 1)

        # col >= 1 : hinge term  relu(pos - neg + margin)
        # col == 0 : regularizer relu(pos - 1)   (exactly once per row)
        hinge = jnp.maximum(pos - s + margin, 0.0)        # (tile_n, K)
        reg = jnp.maximum(pos - 1.0, 0.0)                 # (tile_n, 1) -> broadcast
        contrib = jnp.where(col >= 1, hinge, reg)         # (tile_n, K)

        out_ref[...] += jnp.sum(contrib)

    return kernel


def nce_hinge(scores, margin=1.0, *, tile_n=1024):
    """Pallas implementation of NCE_HINGE.forward.

    scores : (N, K) float array; column 0 = positive, columns 1.. = negatives.
    Returns a scalar loss (float32), identical to the PyTorch module.
    """
    scores = jnp.asarray(scores, jnp.float32)
    N, K = scores.shape

    # Effective row tile: multiple of 8 (sublane), no larger than needed.
    tile_n_eff = min(tile_n, _round_up(N, 8))
    tile_n_eff = max(8, (tile_n_eff // 8) * 8)

    # Pad N up to a multiple of the tile.  Padded rows are built so every relu
    # term is exactly zero (pos = -1e9, negs = 0), so no masking is needed.
    n_pad = _round_up(N, tile_n_eff)
    if n_pad != N:
        pad_rows = n_pad - N
        pad = jnp.concatenate(
            [jnp.full((pad_rows, 1), -1e9, jnp.float32),
             jnp.zeros((pad_rows, K - 1), jnp.float32)],
            axis=1,
        )
        scores_p = jnp.concatenate([scores, pad], axis=0)
    else:
        scores_p = scores

    grid = (n_pad // tile_n_eff,)

    out = pl.pallas_call(
        _make_nce_hinge_kernel(margin),
        out_shape=jax.ShapeDtypeStruct((1, 1), jnp.float32),
        grid_spec=pltpu.PrefetchScalarGridSpec(
            num_scalar_prefetch=0,
            grid=grid,
            in_specs=[
                pl.BlockSpec((tile_n_eff, K), lambda i: (i, 0)),   # scores tile
            ],
            out_specs=pl.BlockSpec((1, 1), lambda i: (0, 0)),      # accumulator
        ),
        compiler_params=pltpu.CompilerParams(
            dimension_semantics=("arbitrary",),   # reduction across the grid
            vmem_limit_bytes=32 * 1024 * 1024,
        ),
    )(scores_p)

    # PyTorch divides both sums by the ORIGINAL batch size N.
    return out[0, 0] / jnp.float32(N)


def _reference(scores, margin=1.0):
    scores = jnp.asarray(scores, jnp.float32)
    n = scores.shape[0]
    pos = scores[:, 0:1]
    hinge = jnp.sum(jax.nn.relu(pos - scores[:, 1:] + margin)) / n
    reg = jnp.sum(jax.nn.relu(scores[:, 0] - 1.0)) / n
    return hinge + reg


if __name__ == "__main__":
    key = jax.random.PRNGKey(0)

    # Small, module-consistent shape: 50 samples, 1 positive + 6 negative scores.
    k1, k2 = jax.random.split(key, 2)
    scores_small = jax.random.normal(k1, (50, 7), jnp.float32) + 0.3

    loss_small = nce_hinge(scores_small, margin=1.0)
    jax.block_until_ready(loss_small)
    ref_small = _reference(scores_small, 1.0)
    assert jnp.allclose(loss_small, ref_small, atol=1e-4, rtol=1e-5), (
        loss_small, ref_small)

    # Larger case exercising multi-step grid accumulation + row padding.
    scores_big = jax.random.normal(k2, (4100, 16), jnp.float32) * 1.2
    loss_big = nce_hinge(scores_big, margin=1.0, tile_n=1024)
    jax.block_until_ready(loss_big)
    ref_big = _reference(scores_big, 1.0)
    assert jnp.allclose(loss_big, ref_big, atol=1e-3, rtol=1e-5), (
        loss_big, ref_big)

    print("KERNEL_OK")
</pallas_src>

<mosaic_0001>
module attributes {stable_mosaic.version = 11 : i64} {
  func.func @kernel(%arg0: i32, %arg1: memref<56x7xf32, #tpu.memory_space<vmem>>, %arg2: memref<1x1xf32, #tpu.memory_space<vmem>>) attributes {dimension_semantics = [#tpu.dimension_semantics<arbitrary>], iteration_bounds = array<i64: 1>, scalar_prefetch = 0 : i64, scratch_operands = 0 : i64, tpu.core_type = #tpu.core_type<tc>, window_params = [{transform_indices = @transform_0, window_bounds = array<i64: 56, 7>}, {pipeline_mode = #tpu.pipeline_mode<synchronous>, transform_indices = @transform_1, window_bounds = array<i64: 1, 1>}]} {
    %c0_i32 = arith.constant 0 : i32
    %0 = arith.cmpi eq, %arg0, %c0_i32 : i32
    %1 = arith.extui %0 : i1 to i32
    %c0_i32_0 = arith.constant 0 : i32
    %2 = arith.cmpi ne, %1, %c0_i32_0 : i32
    scf.if %2 {
      %cst_10 = arith.constant 0.000000e+00 : f32
      %29 = vector.broadcast %cst_10 : f32 to vector<1x1xf32>
      %c0_11 = arith.constant 0 : index
      %c0_12 = arith.constant 0 : index
      %30 = vector.load %arg2[%c0_11, %c0_12] : memref<1x1xf32, #tpu.memory_space<vmem>>, vector<1x1xf32>
      tpu.vector_store %arg2[%c0_11, %c0_12], %29 {strides = array<i32>} : memref<1x1xf32, #tpu.memory_space<vmem>>, vector<1x1xf32>,
    } else {
    }
    %c0 = arith.constant 0 : index
    %c0_1 = arith.constant 0 : index
    %3 = vector.load %arg1[%c0, %c0_1] : memref<56x7xf32, #tpu.memory_space<vmem>>, vector<56x7xf32>
    %4 = vector.extract_strided_slice %3 {offsets = [0, 0], sizes = [56, 1], strides = [1, 1]} : vector<56x7xf32> to vector<56x1xf32>
    %5 = tpu.iota {dimensions = array<i32: 1>} : vector<56x7xi32>
    %6 = vector.broadcast %4 : vector<56x1xf32> to vector<56x7xf32>
    %7 = arith.subf %6, %3 : vector<56x7xf32>
    %cst = arith.constant 1.000000e+00 : f32
    %8 = vector.broadcast %cst : f32 to vector<56x7xf32>
    %9 = arith.addf %7, %8 : vector<56x7xf32>
    %cst_2 = arith.constant 0.000000e+00 : f32
    %10 = vector.broadcast %cst_2 : f32 to vector<56x7xf32>
    %11 = arith.maximumf %9, %10 : vector<56x7xf32>
    %cst_3 = arith.constant 1.000000e+00 : f32
    %12 = vector.broadcast %cst_3 : f32 to vector<56x1xf32>
    %13 = arith.subf %4, %12 : vector<56x1xf32>
    %cst_4 = arith.constant 0.000000e+00 : f32
    %14 = vector.broadcast %cst_4 : f32 to vector<56x1xf32>
    %15 = arith.maximumf %13, %14 : vector<56x1xf32>
    %c1_i32 = arith.constant 1 : i32
    %16 = vector.broadcast %c1_i32 : i32 to vector<56x7xi32>
    %17 = arith.cmpi sge, %5, %16 : vector<56x7xi32>
    %18 = vector.shape_cast %15 : vector<56x1xf32> to vector<56x1xf32>
    %19 = vector.broadcast %18 : vector<56x1xf32> to vector<56x7xf32>
    %20 = arith.select %17, %11, %19 : vector<56x7xi1>, vector<56x7xf32>
    %c0_5 = arith.constant 0 : index
    %c0_6 = arith.constant 0 : index
    %21 = vector.load %arg2[%c0_5, %c0_6] : memref<1x1xf32, #tpu.memory_space<vmem>>, vector<1x1xf32>
    %22 = vector.shape_cast %20 : vector<56x7xf32> to vector<1x56x7xf32>
    %cst_7 = arith.constant dense<0.000000e+00> : vector<1xf32>
    %23 = vector.multi_reduction <add>, %22, %cst_7 [1, 2] : vector<1x56x7xf32> to vector<1xf32>
    %24 = vector.shape_cast %23 : vector<1xf32> to vector<1x1x1xf32>
    %25 = vector.extract %24[0, 0, 0] : f32 from vector<1x1x1xf32>
    %26 = vector.broadcast %25 : f32 to vector<1x1xf32>
    %27 = arith.addf %21, %26 : vector<1x1xf32>
    %c0_8 = arith.constant 0 : index
    %c0_9 = arith.constant 0 : index
    %28 = vector.load %arg2[%c0_8, %c0_9] : memref<1x1xf32, #tpu.memory_space<vmem>>, vector<1x1xf32>
    tpu.vector_store %arg2[%c0_8, %c0_9], %27 {strides = array<i32>} : memref<1x1xf32, #tpu.memory_space<vmem>>, vector<1x1xf32>,
    return
  }
  func.func @transform_0(%arg0: i32) -> (i32, i32) {
    %c0_i32 = arith.constant 0 : i32
    %c0_i32_0 = arith.constant 0 : i32
    return %arg0, %c0_i32 : i32, i32
  }
  func.func @transform_1(%arg0: i32) -> (i32, i32) {
    %c0_i32 = arith.constant 0 : i32
    %c0_i32_0 = arith.constant 0 : i32
    %c0_i32_1 = arith.constant 0 : i32
    return %c0_i32, %c0_i32_0 : i32, i32
  }
}

</mosaic_0001>

<bundles_post_ra>
// kernel: tpu_custom_call.1
= control target key start
LH: loop header
LB: loop body
LE: loop exit
PB: predicated region body
PF: predicated region fallthrough
CT: control target
= control target key end

     0   :  { %v215_v2 = vmov 0   ;;  %s268_s0 = inlined_call_operand.vmem [shape: f32[56,7], index: 0, kind: input, shape index: {}]   ;;  %s269_s1 = inlined_call_operand.hbm [shape: f32[1,1], index: 1, kind: output, shape index: {}]  }
   0x1   :  { %v17_v0 = vld [vmem:[%s268_s0 + $0x10] sm:$0xff]  ;;  %v15_v1 = vld [vmem:[%s268_s0] sm:$0xff]  ;;  %192 = vset.pattern.permute.xlu1 %v215_v2  ;;  %191 = vset.pattern.permute.xlu0 %v215_v2 }
   0x2   :  { %36 = vperm.xlu1 %192, %v17_v0   ;;  %26 = vperm.xlu0 %191, %v15_v1   ;;  %v179_v3 = vadd.f32 -1.0, %v15_v1 }
   0x3   :  { %6 = vsyncpa [#allocation3], 0  ;;  %v18_v4 = vld [vmem:[%s268_s0 + $0x18] sm:$0xff]  ;;  %v16_v5 = vld [vmem:[%s268_s0 + $0x8] sm:$0xff]  ;;  %v181_v9 = vadd.f32 -1.0, %v17_v0  ;;  %v22_v26 = vlaneseq  ;;  %vm138_vm1 = vcmask 56320  }
   0x4   :  { %v180_v6 = vadd.f32 -1.0, %v16_v5  ;;  %v87_v7 = vmax.f32 %v179_v3, 0.0  ;;  %v19_v8 = vld [vmem:[%s268_s0 + $0x20] sm:$0xff]  ;;  %v20_v11 = vld [vmem:[%s268_s0 + $0x28] sm:$0xff]  ;;  %v182_v12 = vadd.f32 -1.0, %v18_v4  ;;  %v21_v15 = vld [vmem:[%s268_s0 + $0x30] sm:$0xff] }
   0x5   :  { %v183_v13 = vadd.f32 -1.0, %v19_v8  ;;  %v89_v14 = vmax.f32 %v181_v9, 0.0  ;;  %v184_v16 = vadd.f32 -1.0, %v20_v11  ;;  %v185_v17 = vadd.f32 -1.0, %v21_v15  ;;  %s217_s0 = smov [#allocation2]  }
   0x6   :  { %41 = vperm.xlu1 %192, %v18_v4   ;;  %31 = vperm.xlu0 %191, %v16_v5   ;;  %v88_v10 = vmax.f32 %v180_v6, 0.0  ;;  %v90_v18 = vmax.f32 %v182_v12, 0.0  ;;  %v23_v32 = vand.u32 127, %v22_v26  ;;  %vm13_vm2 = vcmask 0   ;;  %s171_s20 = sshll.u32 %s217_s0, 4  ;;  %s172_s20 = int_to_ptr.vmem [resolvable:$true] %s171_s20 }
   0x7   :  { %v91_v19 = vmax.f32 %v183_v13, 0.0  ;;  %v92_v20 = vmax.f32 %v184_v16, 0.0  ;;  %v93_v21 = vmax.f32 %v185_v17, 0.0  ;;  %s193_s22 = scalar_lea.vmem %s172_s20, 16  ;;  %s197_s23 = scalar_lea.vmem %s172_s20, 32 }
   0x8   :  { %vm94_vm0 = vcmp.ge.s32.totalorder %v23_v32, 1  ;;  %p194_p0 = scmp.ne.s32.totalorder %s172_s20, %s193_s22  ;;  %p198_p1 = scmp.lt.s32.totalorder %s172_s20, %s172_s20 }
   0x9   :  { %p199_p2 = scmp.lt.s32.totalorder %s197_s23, %s193_s22 }
   0xa   :  { %46 = vperm.xlu0 %191, %v19_v8   ;;  %97 = vperm.xlu1 %192, %v87_v7  }
   0xb   :  { %p200_p3 = por %p199_p2, %p198_p1 }
   0xd   :  { %p201_p4 = pnand %p200_p3, %p194_p0 }
   0xe   :  { %102 = vperm.xlu0 %191, %v88_v10   ;;  %51 = vperm.xlu1 %192, %v20_v11  }
  0x12   :  { %107 = vperm.xlu0 %191, %v89_v14   ;;  %56 = vperm.xlu1 %192, %v21_v15  }
  0x16   :  { %112 = vperm.xlu0 %191, %v90_v18   ;;  %117 = vperm.xlu1 %192, %v91_v19  }
  0x1a   :  { %122 = vperm.xlu0 %191, %v92_v20   ;;  %127 = vperm.xlu1 %192, %v93_v21  }
  0x7d   :  { %v37_v22 = vpop.permute.xlu1 %36  ;;  %v27_v23 = vpop.permute.xlu0 %26 }
  0x7e   :  { %v59_v27 = vsub.f32 %v27_v23, %v15_v1  ;;  %v61_v29 = vsub.f32 %v37_v22, %v17_v0 }
  0x80   :  { %v66_v34 = vadd.f32 1.0, %v59_v27  ;;  %v68_v36 = vadd.f32 1.0, %v61_v29 }
  0x81   :  { %v42_v24 = vpop.permute.xlu1 %41  ;;  %v32_v25 = vpop.permute.xlu0 %31 }
  0x82   :  { %v60_v28 = vsub.f32 %v32_v25, %v16_v5  ;;  %v62_v35 = vsub.f32 %v42_v24, %v18_v4  ;;  %v73_v41 = vmax.f32 %v66_v34, 0.0  ;;  %v75_v44 = vmax.f32 %v68_v36, 0.0 }
  0x84   :  { %v67_v30 = vadd.f32 1.0, %v60_v28  ;;  %v69_v43 = vadd.f32 1.0, %v62_v35 }
  0x85   :  { %v47_v31 = vpop.permute.xlu0 %46  ;;  %v98_v33 = vpop.permute.xlu1 %97 }
  0x86   :  { %v74_v37 = vmax.f32 %v67_v30, 0.0  ;;  %v63_v38 = vsub.f32 %v47_v31, %v19_v8  ;;  %v130_v46 = vsel %vm94_vm0, %v73_v41, %v98_v33  ;;  %v76_v53 = vmax.f32 %v69_v43, 0.0 }
  0x87   :  { %v139_v54 = vsel %vm138_vm1, %v130_v46, 0.0 }
  0x88   :  { %v70_v45 = vadd.f32 1.0, %v63_v38 }
  0x89   :  { %v103_v39 = vpop.permute.xlu0 %102  ;;  %v52_v40 = vpop.permute.xlu1 %51 }
  0x8a   :  { %v131_v42 = vsel %vm94_vm0, %v74_v37, %v103_v39  ;;  %v64_v47 = vsub.f32 %v52_v40, %v20_v11  ;;  %v77_v56 = vmax.f32 %v70_v45, 0.0 }
  0x8b   :  { %v140_v48 = vsel %vm138_vm1, %v131_v42, 0.0 }
  0x8c   :  { %v141_v57 = vadd.f32 %v140_v48, %v139_v54  ;;  %v71_v58 = vadd.f32 1.0, %v64_v47 }
  0x8d   :  { %v108_v49 = vpop.permute.xlu0 %107  ;;  %v57_v50 = vpop.permute.xlu1 %56 }
  0x8e   :  { %v132_v51 = vsel %vm94_vm0, %v75_v44, %v108_v49  ;;  %v65_v52 = vsub.f32 %v57_v50, %v21_v15  ;;  %v78_v2 = vmax.f32 %v71_v58, 0.0  ;;  %v216_v15 = vmov 0.0  }
  0x8f   :  { %v142_v55 = vsel %vm138_vm1, %v132_v51, 0.0  ;;  %14 = vst.msk [vmem:[#allocation2] sm:$0x1] %vm13_vm2, %v216_v15 }
  0x90   :  { %v72_v59 = vadd.f32 1.0, %v65_v52  ;;  %v143_v62 = vadd.f32 %v142_v55, %v141_v57 }
  0x91   :  { %v113_v60 = vpop.permute.xlu0 %112  ;;  %v118_v61 = vpop.permute.xlu1 %117 }
  0x92   :  { %v133_v63 = vsel %vm94_vm0, %v76_v53, %v113_v60  ;;  %v134_v0 = vsel %vm94_vm0, %v77_v56, %v118_v61  ;;  %v79_v3 = vmax.f32 %v72_v59, 0.0 }
  0x93   :  { %v144_v1 = vsel %vm138_vm1, %v133_v63, 0.0  ;;  %v146_v5 = vsel %vm138_vm1, %v134_v0, 0.0 }
  0x94   :  { %v145_v4 = vadd.f32 %v144_v1, %v143_v62 }
  0x95   :  { %v123_v6 = vpop.permute.xlu0 %122  ;;  %v128_v7 = vpop.permute.xlu1 %127 }
  0x96   :  { %v147_v8 = vadd.f32 %v146_v5, %v145_v4  ;;  %v135_v9 = vsel %vm94_vm0, %v78_v2, %v123_v6  ;;  %v136_v10 = vsel %vm94_vm0, %v79_v3, %v128_v7  ;;  %v137_v23 = vld [vmem:[#allocation2] sm:$0x1] }
  0x97   :  { %v148_v11 = vsel %vm138_vm1, %v135_v9, 0.0  ;;  %v150_v13 = vsel %vm138_vm1, %v136_v10, 0.0 }
  0x98   :  { %v149_v12 = vadd.f32 %v148_v11, %v147_v8 }
  0x9a   :  { %v151_v14 = vadd.f32 %v150_v13, %v149_v12 }
  0x9c   :  { %152 = vadd.xlane.f32.xlu0 %v151_v14 }
 0x125   :  { %v153_v16 = vpop.xlane.xlu0 %152 }
 0x126   :  { %v154_v17 = vrot.slane %v153_v16, 4 }
 0x128   :  { %v155_v18 = vadd.f32 %v154_v17, %v153_v16 }
 0x12a   :  { %v156_v19 = vrot.slane %v155_v18, 2 }
 0x12c   :  { %v157_v20 = vadd.f32 %v156_v19, %v155_v18 }
 0x12e   :  { %v158_v21 = vrot.slane %v157_v20, 1 }
 0x130   :  { %v159_v22 = vadd.f32 %v158_v21, %v157_v20 }
 0x132   :  { %186 = vpush %v159_v22 }
 0x163   :  { %s187_s21 = spop %186 }
 0x164   :  { %v161_v24 = vstv %s187_s21 }
 0x165   :  { %v162_v25 = vadd.f32 %v161_v24, %v137_v23 }
 0x167   :  { %164 = vst.msk [vmem:[#allocation2] sm:$0x1] %vm13_vm2, %v162_v25 }
 0x168   :  { %204 = shalt.err (!%p201_p4)
}
 0x169   :  { %174 = dma.vmem_to_hbm [thread:$0]  %s172_s20, 16, %s269_s1, [#allocation3]  }
 0x16a   :  { %213 = dma.done.wait [#allocation3], 16  }
 0x16b   :  { %214 = vsyncadd [#allocation3], 4294967280 }
 0x16c   :  { %178 = vsyncpa [#allocation3], 1 }

</bundles_post_ra>
